<compile_context>
chip_gen: v7x
topology: tpu7x:2x2x1
jax: 0.10.0
libtpu: 0.0.40
codegen_flags: <defaults>
</compile_context>

<pallas_src>
import functools

import jax
import jax.numpy as jnp
from jax import lax
from jax.experimental import pallas as pl
from jax.experimental.pallas import tpu as pltpu


def _largest_divisor_leq(n, cap):
    cap = max(1, min(n, cap))
    for d in range(cap, 0, -1):
        if n % d == 0:
            return d
    return 1


def _lstm_kernel(x_ref, h0_ref, c0_ref, wih_ref, whh_ref, b_ref,
                 wfc_ref, bfc_ref,
                 out_ref,
                 xw_sc, h_sc, cf_sc,
                 *, chunk_steps, batch_block, hidden_size, output_size,
                 matmul_dtype, unroll):
    ct, bb, H, O = chunk_steps, batch_block, hidden_size, output_size
    t_chunk = pl.program_id(1)

    # ---- first time-chunk of each batch block: load state into scratch ----
    @pl.when(t_chunk == 0)
    def _init():
        h_sc[...] = h0_ref[...]
        cf_sc[...] = jnp.zeros_like(cf_sc)
        cf_sc[:, 2 * H:3 * H] = c0_ref[...]     # cell state lives in the g lanes

    # ---- hoisted input projection for this chunk (not on the serial path) --
    # (ct*bb, E) @ (E, 4H) + (b_ih + b_hh), f32 accumulate, resident in VMEM.
    xw_sc[...] = (
        jnp.dot(x_ref[...], wih_ref[...], preferred_element_type=jnp.float32)
        + b_ref[...]
    )

    whh = whh_ref[...]                           # (H, 4H), read once per chunk

    # Lane mask over the 4H gate axis: PyTorch gate order [i, f, g, o];
    # only the g block uses tanh.  Hoisted out of the recurrence.
    lane = lax.broadcasted_iota(jnp.int32, (bb, 4 * H), 1)
    is_g = jnp.logical_and(lane >= 2 * H, lane < 3 * H)

    def step(s, carry):
        h, cf = carry                            # h: (bb, H) f32; cf: (bb, 4H) f32
        row = pl.multiple_of(s * bb, bb)         # sublane-aligned slice start
        gates = xw_sc[pl.ds(row, bb), :] + jnp.dot(
            h.astype(matmul_dtype), whh,
            preferred_element_type=jnp.float32)  # (bb, 4H) f32

        # One EUP pass over the full vreg: sigmoid everywhere, and
        # tanh(x) = 2*sigmoid(2x) - 1 on the g lanes.
        pre = jnp.where(is_g, 2.0 * gates, gates)
        s_act = jax.nn.sigmoid(pre)
        acts = jnp.where(is_g, 2.0 * s_act - 1.0, s_act)

        # Full-(bb,4H)-vreg cell update; only the g lanes are meaningful,
        # other lanes hold bounded don't-care values.  XLU rolls align
        # f / i / o over the g lanes (free slot vs. VALU).
        f_on_g = pltpu.roll(acts, shift=H, axis=1)
        i_on_g = pltpu.roll(acts, shift=2 * H, axis=1)
        o_on_g = pltpu.roll(acts, shift=3 * H, axis=1)
        cf_new = f_on_g * cf + i_on_g * acts
        h_new = (o_on_g * jnp.tanh(cf_new))[:, 2 * H:3 * H]   # one lane extract
        return h_new, cf_new

    h_T, cf_T = lax.fori_loop(0, ct, step, (h_sc[...], cf_sc[...]),
                              unroll=unroll)
    h_sc[...] = h_T
    cf_sc[...] = cf_T

    # ---- last chunk: fc + log_softmax; emit one lane-dense output slab ----
    @pl.when(t_chunk == pl.num_programs(1) - 1)
    def _finalize():
        logits = (jnp.dot(h_T.astype(matmul_dtype), wfc_ref[...],
                          preferred_element_type=jnp.float32)
                  + bfc_ref[...])                              # (bb, O)
        m = jnp.max(logits, axis=-1, keepdims=True)
        lse = jnp.log(jnp.sum(jnp.exp(logits - m), axis=-1, keepdims=True)) + m
        out_ref[...] = jnp.zeros_like(out_ref)
        out_ref[:, 0:O] = logits - lse
        out_ref[:, O:O + H] = h_T
        out_ref[:, O + H:O + 2 * H] = cf_T[:, 2 * H:3 * H]


def lstm_forward(x, h0, c0, params, *, matmul_dtype=jnp.bfloat16,
                 batch_block=8, t_chunk=None, chunk_budget_bytes=4 * 2**20):
    """x: (batch, seq, input_size); h0, c0: (1, batch, hidden).

    Returns (out, hn, cn) matching the PyTorch module:
      out: (batch, output_size) log-probabilities
      hn, cn: (1, batch, hidden)

    matmul_dtype: MXU operand dtype for all three matmuls (bf16 is valid on
    v5e/v6e/v7x; accumulation and all gate/cell-state math stay f32).
    t_chunk: optional time-chunk length (must divide seq); default picks the
    largest divisor of seq whose streamed footprint fits chunk_budget_bytes.
    """
    w_ih, w_hh, b_ih, b_hh, w_fc, b_fc = params
    B, T, E = x.shape
    H = w_hh.shape[1]
    O = w_fc.shape[0]

    bb = batch_block
    assert bb % 8 == 0
    Bp = ((B + bb - 1) // bb) * bb
    nb = Bp // bb

    if t_chunk is None:
        per_step = bb * (E + 4 * H) * 4
        ct = _largest_divisor_leq(T, chunk_budget_bytes // per_step)
    else:
        assert T % t_chunk == 0
        ct = t_chunk
    nt = T // ct
    unroll = ct if ct <= 8 else _largest_divisor_leq(ct, 8)

    Wout = max(128, ((O + 2 * H + 127) // 128) * 128)

    # --- wrapper glue on x: one transpose copy + one fused pad/cast ---------
    x_t = jnp.transpose(x, (1, 0, 2))                                 # (T, B, E)
    x_t = jnp.pad(x_t, ((0, 0), (0, Bp - B), (0, 0))).astype(matmul_dtype)
    x_blk = (x_t.reshape(T, nb, bb, E).transpose(1, 0, 2, 3)
             .reshape(nb, T * bb, E))                                 # (nb, T*bb, E)

    h0p = jnp.pad(h0[0].astype(jnp.float32), ((0, Bp - B), (0, 0)))   # (Bp, H)
    c0p = jnp.pad(c0[0].astype(jnp.float32), ((0, Bp - B), (0, 0)))

    # Pre-transpose weights so in-kernel matmuls are x @ (E,4H), h @ (H,4H),
    # h @ (H,O); pre-sum the two bias vectors.
    wih_t = w_ih.T.astype(matmul_dtype)                   # (E, 4H)
    whh_t = w_hh.T.astype(matmul_dtype)                   # (H, 4H)
    b = (b_ih + b_hh).reshape(1, 4 * H).astype(jnp.float32)
    wfc_t = w_fc.T.astype(matmul_dtype)                   # (H, O)
    bfc = b_fc.reshape(1, O).astype(jnp.float32)

    kernel = functools.partial(
        _lstm_kernel, chunk_steps=ct, batch_block=bb, hidden_size=H,
        output_size=O, matmul_dtype=matmul_dtype, unroll=unroll)

    md_bytes = jnp.dtype(matmul_dtype).itemsize
    flops = (2 * T * Bp * E * 4 * H) + (2 * T * Bp * H * 4 * H) + (2 * Bp * H * O)
    transcendentals = T * Bp * 8 * H + Bp * O
    bytes_accessed = (x_blk.size * md_bytes
                      + (wih_t.size + whh_t.size + wfc_t.size) * md_bytes
                      + (h0p.size + c0p.size + b.size + bfc.size) * 4
                      + Bp * Wout * 4)
    est_vmem = (2 * ct * bb * E * md_bytes + ct * bb * 4 * H * 4
                + (wih_t.size + whh_t.size + wfc_t.size) * md_bytes
                + 2 * bb * Wout * 4 + bb * 10 * H * 4 + (2 << 20))
    vmem_limit = int(min(64 * 2**20, max(32 * 2**20, 2 * est_vmem)))

    slab = pl.pallas_call(
        kernel,
        out_shape=jax.ShapeDtypeStruct((Bp, Wout), jnp.float32),
        grid=(nb, nt),
        in_specs=[
            pl.BlockSpec((None, ct * bb, E), lambda i, t: (i, t, 0)),  # x chunk
            pl.BlockSpec((bb, H), lambda i, t: (i, 0)),                # h0
            pl.BlockSpec((bb, H), lambda i, t: (i, 0)),                # c0
            pl.BlockSpec((E, 4 * H), lambda i, t: (0, 0)),             # w_ih^T
            pl.BlockSpec((H, 4 * H), lambda i, t: (0, 0)),             # w_hh^T
            pl.BlockSpec((1, 4 * H), lambda i, t: (0, 0)),             # b_ih+b_hh
            pl.BlockSpec((H, O), lambda i, t: (0, 0)),                 # w_fc^T
            pl.BlockSpec((1, O), lambda i, t: (0, 0)),                 # b_fc
        ],
        out_specs=pl.BlockSpec((bb, Wout), lambda i, t: (i, 0)),
        scratch_shapes=[
            pltpu.VMEM((ct * bb, 4 * H), jnp.float32),   # hoisted x-projection
            pltpu.VMEM((bb, H), jnp.float32),            # carried h
            pltpu.VMEM((bb, 4 * H), jnp.float32),        # carried c (g lanes)
        ],
        compiler_params=pltpu.CompilerParams(
            dimension_semantics=("parallel", "arbitrary"),
            vmem_limit_bytes=vmem_limit),
        cost_estimate=pl.CostEstimate(flops=int(flops),
                                      transcendentals=int(transcendentals),
                                      bytes_accessed=int(bytes_accessed)),
    )(x_blk, h0p, c0p, wih_t, whh_t, b, wfc_t, bfc)

    out = slab[:B, 0:O]
    hn = slab[:B, O:O + H][None]          # (1, B, H)
    cn = slab[:B, O + H:O + 2 * H][None]
    return out, hn, cn


def _init_params(key, input_size, hidden_size, output_size):
    """Deterministic init mimicking PyTorch's U(-1/sqrt(H), 1/sqrt(H))."""
    ks = jax.random.split(key, 6)
    bound = 1.0 / jnp.sqrt(hidden_size)
    w_ih = jax.random.uniform(ks[0], (4 * hidden_size, input_size),
                              minval=-bound, maxval=bound, dtype=jnp.float32)
    w_hh = jax.random.uniform(ks[1], (4 * hidden_size, hidden_size),
                              minval=-bound, maxval=bound, dtype=jnp.float32)
    b_ih = jax.random.uniform(ks[2], (4 * hidden_size,),
                              minval=-bound, maxval=bound, dtype=jnp.float32)
    b_hh = jax.random.uniform(ks[3], (4 * hidden_size,),
                              minval=-bound, maxval=bound, dtype=jnp.float32)
    w_fc = jax.random.uniform(ks[4], (output_size, hidden_size),
                              minval=-bound, maxval=bound, dtype=jnp.float32)
    b_fc = jax.random.uniform(ks[5], (output_size,),
                              minval=-bound, maxval=bound, dtype=jnp.float32)
    return (w_ih, w_hh, b_ih, b_hh, w_fc, b_fc)


def _ref_forward(x, h0, c0, params):
    """Pure-JAX reference of the PyTorch forward (correctness check)."""
    w_ih, w_hh, b_ih, b_hh, w_fc, b_fc = params
    H = w_hh.shape[1]
    x_t = jnp.transpose(x, (1, 0, 2))          # (T, B, E)
    h, c = h0[0], c0[0]
    for t in range(x_t.shape[0]):
        gates = x_t[t] @ w_ih.T + b_ih + h @ w_hh.T + b_hh
        i = jax.nn.sigmoid(gates[:, 0:H])
        f = jax.nn.sigmoid(gates[:, H:2 * H])
        g = jnp.tanh(gates[:, 2 * H:3 * H])
        o = jax.nn.sigmoid(gates[:, 3 * H:4 * H])
        c = f * c + i * g
        h = o * jnp.tanh(c)
    logits = h @ w_fc.T + b_fc
    out = jax.nn.log_softmax(logits, axis=-1)
    return out, h[None], c[None]


if __name__ == "__main__":
    # Shapes consistent with the module: embedding dim 16, hidden 32,
    # 8 output classes, batch 2, sequence length 8, num_layers=1.
    B, T, E, H, O = 2, 8, 16, 32, 8

    key = jax.random.PRNGKey(0)
    k_param, k_x, k_x2, k_h2, k_c2 = jax.random.split(key, 5)
    params = _init_params(k_param, E, H, O)

    x = jax.random.normal(k_x, (B, T, E), dtype=jnp.float32)
    h0 = jnp.zeros((1, B, H), dtype=jnp.float32)   # module.initHidden()
    c0 = jnp.zeros((1, B, H), dtype=jnp.float32)

    out_r, hn_r, cn_r = _ref_forward(x, h0, c0, params)

    # f32 MXU operands: tight check against the pure-JAX reference.
    out, hn, cn = lstm_forward(x, h0, c0, params, matmul_dtype=jnp.float32)
    jax.block_until_ready((out, hn, cn))
    assert jnp.allclose(out, out_r, atol=1e-4, rtol=1e-4)
    assert jnp.allclose(hn, hn_r, atol=1e-4, rtol=1e-4)
    assert jnp.allclose(cn, cn_r, atol=1e-4, rtol=1e-4)

    # Default bf16 MXU operands (f32 accumulation / gate math): looser check.
    out_b, hn_b, cn_b = lstm_forward(x, h0, c0, params)
    jax.block_until_ready((out_b, hn_b, cn_b))
    assert jnp.allclose(out_b, out_r, atol=1e-1, rtol=1e-1)

    # Exercise the gridded path: 2 batch blocks ("parallel" axis, second TC on
    # v7x) x 3 time chunks ("arbitrary" axis, h/c carried in VMEM scratch),
    # with non-zero initial state and padded batch.
    B2, T2 = 10, 12
    x2 = jax.random.normal(k_x2, (B2, T2, E), dtype=jnp.float32)
    h02 = 0.1 * jax.random.normal(k_h2, (1, B2, H), dtype=jnp.float32)
    c02 = 0.1 * jax.random.normal(k_c2, (1, B2, H), dtype=jnp.float32)
    out2, hn2, cn2 = lstm_forward(x2, h02, c02, params,
                                  matmul_dtype=jnp.float32, t_chunk=4)
    jax.block_until_ready((out2, hn2, cn2))
    out2_r, hn2_r, cn2_r = _ref_forward(x2, h02, c02, params)
    assert jnp.allclose(out2, out2_r, atol=1e-4, rtol=1e-4)
    assert jnp.allclose(hn2, hn2_r, atol=1e-4, rtol=1e-4)
    assert jnp.allclose(cn2, cn2_r, atol=1e-4, rtol=1e-4)

    print("KERNEL_OK")
</pallas_src>

<mosaic_0001>
module attributes {stable_mosaic.version = 11 : i64} {
  func.func @_lstm_kernel(%arg0: i32, %arg1: i32, %arg2: memref<1x64x16xf32, #tpu.memory_space<vmem>>, %arg3: memref<8x32xf32, #tpu.memory_space<vmem>>, %arg4: memref<8x32xf32, #tpu.memory_space<vmem>>, %arg5: memref<16x128xf32, #tpu.memory_space<vmem>>, %arg6: memref<32x128xf32, #tpu.memory_space<vmem>>, %arg7: memref<1x128xf32, #tpu.memory_space<vmem>>, %arg8: memref<32x8xf32, #tpu.memory_space<vmem>>, %arg9: memref<1x8xf32, #tpu.memory_space<vmem>>, %arg10: memref<8x128xf32, #tpu.memory_space<vmem>>, %arg11: memref<64x128xf32, #tpu.memory_space<vmem>>, %arg12: memref<8x32xf32, #tpu.memory_space<vmem>>, %arg13: memref<8x128xf32, #tpu.memory_space<vmem>>) attributes {dimension_semantics = [#tpu.dimension_semantics<parallel>, #tpu.dimension_semantics<arbitrary>], iteration_bounds = array<i64: 1, 1>, scalar_prefetch = 0 : i64, scratch_operands = 3 : i64, tpu.core_type = #tpu.core_type<tc>, window_params = [{transform_indices = @transform_0, window_bounds = array<i64: 1, 64, 16>}, {transform_indices = @transform_1, window_bounds = array<i64: 8, 32>}, {transform_indices = @transform_2, window_bounds = array<i64: 8, 32>}, {pipeline_mode = #tpu.pipeline_mode<synchronous>, transform_indices = @transform_3, window_bounds = array<i64: 16, 128>}, {pipeline_mode = #tpu.pipeline_mode<synchronous>, transform_indices = @transform_4, window_bounds = array<i64: 32, 128>}, {pipeline_mode = #tpu.pipeline_mode<synchronous>, transform_indices = @transform_5, window_bounds = array<i64: 1, 128>}, {pipeline_mode = #tpu.pipeline_mode<synchronous>, transform_indices = @transform_6, window_bounds = array<i64: 32, 8>}, {pipeline_mode = #tpu.pipeline_mode<synchronous>, transform_indices = @transform_7, window_bounds = array<i64: 1, 8>}, {transform_indices = @transform_8, window_bounds = array<i64: 8, 128>}]} {
    %c0_i32 = arith.constant 0 : i32
    %0 = arith.cmpi eq, %arg1, %c0_i32 : i32
    %1 = arith.extui %0 : i1 to i32
    %c0_i32_0 = arith.constant 0 : i32
    %2 = arith.cmpi ne, %1, %c0_i32_0 : i32
    scf.if %2 {
      %c0_101 = arith.constant 0 : index
      %c0_102 = arith.constant 0 : index
      %249 = vector.load %arg3[%c0_101, %c0_102] : memref<8x32xf32, #tpu.memory_space<vmem>>, vector<8x32xf32>
      %c0_103 = arith.constant 0 : index
      %c0_104 = arith.constant 0 : index
      %250 = vector.load %arg12[%c0_103, %c0_104] : memref<8x32xf32, #tpu.memory_space<vmem>>, vector<8x32xf32>
      tpu.vector_store %arg12[%c0_103, %c0_104], %249 {strides = array<i32>} : memref<8x32xf32, #tpu.memory_space<vmem>>, vector<8x32xf32>,
      %cst_105 = arith.constant 0.000000e+00 : f32
      %251 = vector.broadcast %cst_105 : f32 to vector<8x128xf32>
      %c0_106 = arith.constant 0 : index
      %c0_107 = arith.constant 0 : index
      %252 = vector.load %arg13[%c0_106, %c0_107] : memref<8x128xf32, #tpu.memory_space<vmem>>, vector<8x128xf32>
      tpu.vector_store %arg13[%c0_106, %c0_107], %251 {strides = array<i32>} : memref<8x128xf32, #tpu.memory_space<vmem>>, vector<8x128xf32>,
      %c0_108 = arith.constant 0 : index
      %c0_109 = arith.constant 0 : index
      %253 = vector.load %arg4[%c0_108, %c0_109] : memref<8x32xf32, #tpu.memory_space<vmem>>, vector<8x32xf32>
      %c0_110 = arith.constant 0 : index
      %c64 = arith.constant 64 : index
      %254 = vector.load %arg13[%c0_110, %c64] : memref<8x128xf32, #tpu.memory_space<vmem>>, vector<8x32xf32>
      tpu.vector_store %arg13[%c0_110, %c64], %253 {strides = array<i32>} : memref<8x128xf32, #tpu.memory_space<vmem>>, vector<8x32xf32>,
    } else {
    }
    %c0 = arith.constant 0 : index
    %c0_1 = arith.constant 0 : index
    %c0_2 = arith.constant 0 : index
    %3 = vector.load %arg2[%c0, %c0_1, %c0_2] : memref<1x64x16xf32, #tpu.memory_space<vmem>>, vector<1x64x16xf32>
    %4 = vector.shape_cast %3 : vector<1x64x16xf32> to vector<64x16xf32>
    %c0_3 = arith.constant 0 : index
    %c0_4 = arith.constant 0 : index
    %5 = vector.load %arg5[%c0_3, %c0_4] : memref<16x128xf32, #tpu.memory_space<vmem>>, vector<16x128xf32>
    %cst = arith.constant dense<0.000000e+00> : vector<64x128xf32>
    %6 = tpu.matmul %4, %5, %cst {dimension_numbers = #tpu.dot_dimension_numbers<[1], [0], [0], [1], [0, 0, 1, 1], [], []>} : vector<64x16xf32>, vector<16x128xf32>, vector<64x128xf32> -> vector<64x128xf32>
    %c0_5 = arith.constant 0 : index
    %c0_6 = arith.constant 0 : index
    %7 = vector.load %arg7[%c0_5, %c0_6] : memref<1x128xf32, #tpu.memory_space<vmem>>, vector<1x128xf32>
    %8 = vector.broadcast %7 : vector<1x128xf32> to vector<64x128xf32>
    %9 = arith.addf %6, %8 : vector<64x128xf32>
    %c0_7 = arith.constant 0 : index
    %c0_8 = arith.constant 0 : index
    %10 = vector.load %arg11[%c0_7, %c0_8] : memref<64x128xf32, #tpu.memory_space<vmem>>, vector<64x128xf32>
    tpu.vector_store %arg11[%c0_7, %c0_8], %9 {strides = array<i32>} : memref<64x128xf32, #tpu.memory_space<vmem>>, vector<64x128xf32>,
    %c0_9 = arith.constant 0 : index
    %c0_10 = arith.constant 0 : index
    %11 = vector.load %arg6[%c0_9, %c0_10] : memref<32x128xf32, #tpu.memory_space<vmem>>, vector<32x128xf32>
    %12 = tpu.iota {dimensions = array<i32: 1>} : vector<8x128xi32>
    %c64_i32 = arith.constant 64 : i32
    %13 = vector.broadcast %c64_i32 : i32 to vector<8x128xi32>
    %14 = arith.cmpi sge, %12, %13 : vector<8x128xi32>
    %c96_i32 = arith.constant 96 : i32
    %15 = vector.broadcast %c96_i32 : i32 to vector<8x128xi32>
    %16 = arith.cmpi slt, %12, %15 : vector<8x128xi32>
    %17 = arith.andi %14, %16 : vector<8x128xi1>
    %c0_11 = arith.constant 0 : index
    %c0_12 = arith.constant 0 : index
    %18 = vector.load %arg12[%c0_11, %c0_12] : memref<8x32xf32, #tpu.memory_space<vmem>>, vector<8x32xf32>
    %c0_13 = arith.constant 0 : index
    %c0_14 = arith.constant 0 : index
    %19 = vector.load %arg13[%c0_13, %c0_14] : memref<8x128xf32, #tpu.memory_space<vmem>>, vector<8x128xf32>
    %c0_i32_15 = arith.constant 0 : i32
    %c8_i32 = arith.constant 8 : i32
    %20 = arith.muli %c0_i32_15, %c8_i32 : i32
    %21 = tpu.assume_multiple %20, 8 : i32
    %22 = arith.index_cast %21 : i32 to index
    %c0_16 = arith.constant 0 : index
    %23 = vector.load %arg11[%22, %c0_16] : memref<64x128xf32, #tpu.memory_space<vmem>>, vector<8x128xf32>
    %cst_17 = arith.constant dense<0.000000e+00> : vector<8x128xf32>
    %24 = tpu.matmul %18, %11, %cst_17 {dimension_numbers = #tpu.dot_dimension_numbers<[1], [0], [0], [1], [0, 0, 1, 1], [], []>} : vector<8x32xf32>, vector<32x128xf32>, vector<8x128xf32> -> vector<8x128xf32>
    %25 = arith.addf %23, %24 : vector<8x128xf32>
    %cst_18 = arith.constant 2.000000e+00 : f32
    %26 = vector.broadcast %cst_18 : f32 to vector<8x128xf32>
    %27 = arith.mulf %26, %25 : vector<8x128xf32>
    %28 = arith.select %17, %27, %25 : vector<8x128xi1>, vector<8x128xf32>
    %29 = arith.negf %28 : vector<8x128xf32>
    %30 = math.exp %29 : vector<8x128xf32>
    %cst_19 = arith.constant 1.000000e+00 : f32
    %31 = vector.broadcast %cst_19 : f32 to vector<8x128xf32>
    %32 = arith.addf %31, %30 : vector<8x128xf32>
    %33 = arith.divf %31, %32 : vector<8x128xf32>
    %cst_20 = arith.constant 2.000000e+00 : f32
    %34 = vector.broadcast %cst_20 : f32 to vector<8x128xf32>
    %35 = arith.mulf %34, %33 : vector<8x128xf32>
    %cst_21 = arith.constant 1.000000e+00 : f32
    %36 = vector.broadcast %cst_21 : f32 to vector<8x128xf32>
    %37 = arith.subf %35, %36 : vector<8x128xf32>
    %38 = arith.select %17, %37, %33 : vector<8x128xi1>, vector<8x128xf32>
    %c32_i32 = arith.constant 32 : i32
    %39 = tpu.dynamic_rotate %38 by %c32_i32 dim 1 : vector<8x128xf32>, i32 -> vector<8x128xf32>
    %c64_i32_22 = arith.constant 64 : i32
    %40 = tpu.dynamic_rotate %38 by %c64_i32_22 dim 1 : vector<8x128xf32>, i32 -> vector<8x128xf32>
    %c96_i32_23 = arith.constant 96 : i32
    %41 = tpu.dynamic_rotate %38 by %c96_i32_23 dim 1 : vector<8x128xf32>, i32 -> vector<8x128xf32>
    %42 = arith.mulf %39, %19 : vector<8x128xf32>
    %43 = arith.mulf %40, %38 : vector<8x128xf32>
    %44 = arith.addf %42, %43 : vector<8x128xf32>
    %45 = math.tanh %44 : vector<8x128xf32>
    %46 = arith.mulf %41, %45 : vector<8x128xf32>
    %47 = vector.extract_strided_slice %46 {offsets = [0, 64], sizes = [8, 32], strides = [1, 1]} : vector<8x128xf32> to vector<8x32xf32>
    %c1_i32 = arith.constant 1 : i32
    %c8_i32_24 = arith.constant 8 : i32
    %48 = arith.muli %c1_i32, %c8_i32_24 : i32
    %49 = tpu.assume_multiple %48, 8 : i32
    %50 = arith.index_cast %49 : i32 to index
    %c0_25 = arith.constant 0 : index
    %51 = vector.load %arg11[%50, %c0_25] : memref<64x128xf32, #tpu.memory_space<vmem>>, vector<8x128xf32>
    %cst_26 = arith.constant dense<0.000000e+00> : vector<8x128xf32>
    %52 = tpu.matmul %47, %11, %cst_26 {dimension_numbers = #tpu.dot_dimension_numbers<[1], [0], [0], [1], [0, 0, 1, 1], [], []>} : vector<8x32xf32>, vector<32x128xf32>, vector<8x128xf32> -> vector<8x128xf32>
    %53 = arith.addf %51, %52 : vector<8x128xf32>
    %cst_27 = arith.constant 2.000000e+00 : f32
    %54 = vector.broadcast %cst_27 : f32 to vector<8x128xf32>
    %55 = arith.mulf %54, %53 : vector<8x128xf32>
    %56 = arith.select %17, %55, %53 : vector<8x128xi1>, vector<8x128xf32>
    %57 = arith.negf %56 : vector<8x128xf32>
    %58 = math.exp %57 : vector<8x128xf32>
    %cst_28 = arith.constant 1.000000e+00 : f32
    %59 = vector.broadcast %cst_28 : f32 to vector<8x128xf32>
    %60 = arith.addf %59, %58 : vector<8x128xf32>
    %61 = arith.divf %59, %60 : vector<8x128xf32>
    %cst_29 = arith.constant 2.000000e+00 : f32
    %62 = vector.broadcast %cst_29 : f32 to vector<8x128xf32>
    %63 = arith.mulf %62, %61 : vector<8x128xf32>
    %cst_30 = arith.constant 1.000000e+00 : f32
    %64 = vector.broadcast %cst_30 : f32 to vector<8x128xf32>
    %65 = arith.subf %63, %64 : vector<8x128xf32>
    %66 = arith.select %17, %65, %61 : vector<8x128xi1>, vector<8x128xf32>
    %c32_i32_31 = arith.constant 32 : i32
    %67 = tpu.dynamic_rotate %66 by %c32_i32_31 dim 1 : vector<8x128xf32>, i32 -> vector<8x128xf32>
    %c64_i32_32 = arith.constant 64 : i32
    %68 = tpu.dynamic_rotate %66 by %c64_i32_32 dim 1 : vector<8x128xf32>, i32 -> vector<8x128xf32>
    %c96_i32_33 = arith.constant 96 : i32
    %69 = tpu.dynamic_rotate %66 by %c96_i32_33 dim 1 : vector<8x128xf32>, i32 -> vector<8x128xf32>
    %70 = arith.mulf %67, %44 : vector<8x128xf32>
    %71 = arith.mulf %68, %66 : vector<8x128xf32>
    %72 = arith.addf %70, %71 : vector<8x128xf32>
    %73 = math.tanh %72 : vector<8x128xf32>
    %74 = arith.mulf %69, %73 : vector<8x128xf32>
    %75 = vector.extract_strided_slice %74 {offsets = [0, 64], sizes = [8, 32], strides = [1, 1]} : vector<8x128xf32> to vector<8x32xf32>
    %c2_i32 = arith.constant 2 : i32
    %c8_i32_34 = arith.constant 8 : i32
    %76 = arith.muli %c2_i32, %c8_i32_34 : i32
    %77 = tpu.assume_multiple %76, 8 : i32
    %78 = arith.index_cast %77 : i32 to index
    %c0_35 = arith.constant 0 : index
    %79 = vector.load %arg11[%78, %c0_35] : memref<64x128xf32, #tpu.memory_space<vmem>>, vector<8x128xf32>
    %cst_36 = arith.constant dense<0.000000e+00> : vector<8x128xf32>
    %80 = tpu.matmul %75, %11, %cst_36 {dimension_numbers = #tpu.dot_dimension_numbers<[1], [0], [0], [1], [0, 0, 1, 1], [], []>} : vector<8x32xf32>, vector<32x128xf32>, vector<8x128xf32> -> vector<8x128xf32>
    %81 = arith.addf %79, %80 : vector<8x128xf32>
    %cst_37 = arith.constant 2.000000e+00 : f32
    %82 = vector.broadcast %cst_37 : f32 to vector<8x128xf32>
    %83 = arith.mulf %82, %81 : vector<8x128xf32>
    %84 = arith.select %17, %83, %81 : vector<8x128xi1>, vector<8x128xf32>
    %85 = arith.negf %84 : vector<8x128xf32>
    %86 = math.exp %85 : vector<8x128xf32>
    %cst_38 = arith.constant 1.000000e+00 : f32
    %87 = vector.broadcast %cst_38 : f32 to vector<8x128xf32>
    %88 = arith.addf %87, %86 : vector<8x128xf32>
    %89 = arith.divf %87, %88 : vector<8x128xf32>
    %cst_39 = arith.constant 2.000000e+00 : f32
    %90 = vector.broadcast %cst_39 : f32 to vector<8x128xf32>
    %91 = arith.mulf %90, %89 : vector<8x128xf32>
    %cst_40 = arith.constant 1.000000e+00 : f32
    %92 = vector.broadcast %cst_40 : f32 to vector<8x128xf32>
    %93 = arith.subf %91, %92 : vector<8x128xf32>
    %94 = arith.select %17, %93, %89 : vector<8x128xi1>, vector<8x128xf32>
    %c32_i32_41 = arith.constant 32 : i32
    %95 = tpu.dynamic_rotate %94 by %c32_i32_41 dim 1 : vector<8x128xf32>, i32 -> vector<8x128xf32>
    %c64_i32_42 = arith.constant 64 : i32
    %96 = tpu.dynamic_rotate %94 by %c64_i32_42 dim 1 : vector<8x128xf32>, i32 -> vector<8x128xf32>
    %c96_i32_43 = arith.constant 96 : i32
    %97 = tpu.dynamic_rotate %94 by %c96_i32_43 dim 1 : vector<8x128xf32>, i32 -> vector<8x128xf32>
    %98 = arith.mulf %95, %72 : vector<8x128xf32>
    %99 = arith.mulf %96, %94 : vector<8x128xf32>
    %100 = arith.addf %98, %99 : vector<8x128xf32>
    %101 = math.tanh %100 : vector<8x128xf32>
    %102 = arith.mulf %97, %101 : vector<8x128xf32>
    %103 = vector.extract_strided_slice %102 {offsets = [0, 64], sizes = [8, 32], strides = [1, 1]} : vector<8x128xf32> to vector<8x32xf32>
    %c3_i32 = arith.constant 3 : i32
    %c8_i32_44 = arith.constant 8 : i32
    %104 = arith.muli %c3_i32, %c8_i32_44 : i32
    %105 = tpu.assume_multiple %104, 8 : i32
    %106 = arith.index_cast %105 : i32 to index
    %c0_45 = arith.constant 0 : index
    %107 = vector.load %arg11[%106, %c0_45] : memref<64x128xf32, #tpu.memory_space<vmem>>, vector<8x128xf32>
    %cst_46 = arith.constant dense<0.000000e+00> : vector<8x128xf32>
    %108 = tpu.matmul %103, %11, %cst_46 {dimension_numbers = #tpu.dot_dimension_numbers<[1], [0], [0], [1], [0, 0, 1, 1], [], []>} : vector<8x32xf32>, vector<32x128xf32>, vector<8x128xf32> -> vector<8x128xf32>
    %109 = arith.addf %107, %108 : vector<8x128xf32>
    %cst_47 = arith.constant 2.000000e+00 : f32
    %110 = vector.broadcast %cst_47 : f32 to vector<8x128xf32>
    %111 = arith.mulf %110, %109 : vector<8x128xf32>
    %112 = arith.select %17, %111, %109 : vector<8x128xi1>, vector<8x128xf32>
    %113 = arith.negf %112 : vector<8x128xf32>
    %114 = math.exp %113 : vector<8x128xf32>
    %cst_48 = arith.constant 1.000000e+00 : f32
    %115 = vector.broadcast %cst_48 : f32 to vector<8x128xf32>
    %116 = arith.addf %115, %114 : vector<8x128xf32>
    %117 = arith.divf %115, %116 : vector<8x128xf32>
    %cst_49 = arith.constant 2.000000e+00 : f32
    %118 = vector.broadcast %cst_49 : f32 to vector<8x128xf32>
    %119 = arith.mulf %118, %117 : vector<8x128xf32>
    %cst_50 = arith.constant 1.000000e+00 : f32
    %120 = vector.broadcast %cst_50 : f32 to vector<8x128xf32>
    %121 = arith.subf %119, %120 : vector<8x128xf32>
    %122 = arith.select %17, %121, %117 : vector<8x128xi1>, vector<8x128xf32>
    %c32_i32_51 = arith.constant 32 : i32
    %123 = tpu.dynamic_rotate %122 by %c32_i32_51 dim 1 : vector<8x128xf32>, i32 -> vector<8x128xf32>
    %c64_i32_52 = arith.constant 64 : i32
    %124 = tpu.dynamic_rotate %122 by %c64_i32_52 dim 1 : vector<8x128xf32>, i32 -> vector<8x128xf32>
    %c96_i32_53 = arith.constant 96 : i32
    %125 = tpu.dynamic_rotate %122 by %c96_i32_53 dim 1 : vector<8x128xf32>, i32 -> vector<8x128xf32>
    %126 = arith.mulf %123, %100 : vector<8x128xf32>
    %127 = arith.mulf %124, %122 : vector<8x128xf32>
    %128 = arith.addf %126, %127 : vector<8x128xf32>
    %129 = math.tanh %128 : vector<8x128xf32>
    %130 = arith.mulf %125, %129 : vector<8x128xf32>
    %131 = vector.extract_strided_slice %130 {offsets = [0, 64], sizes = [8, 32], strides = [1, 1]} : vector<8x128xf32> to vector<8x32xf32>
    %c4_i32 = arith.constant 4 : i32
    %c8_i32_54 = arith.constant 8 : i32
    %132 = arith.muli %c4_i32, %c8_i32_54 : i32
    %133 = tpu.assume_multiple %132, 8 : i32
    %134 = arith.index_cast %133 : i32 to index
    %c0_55 = arith.constant 0 : index
    %135 = vector.load %arg11[%134, %c0_55] : memref<64x128xf32, #tpu.memory_space<vmem>>, vector<8x128xf32>
    %cst_56 = arith.constant dense<0.000000e+00> : vector<8x128xf32>
    %136 = tpu.matmul %131, %11, %cst_56 {dimension_numbers = #tpu.dot_dimension_numbers<[1], [0], [0], [1], [0, 0, 1, 1], [], []>} : vector<8x32xf32>, vector<32x128xf32>, vector<8x128xf32> -> vector<8x128xf32>
    %137 = arith.addf %135, %136 : vector<8x128xf32>
    %cst_57 = arith.constant 2.000000e+00 : f32
    %138 = vector.broadcast %cst_57 : f32 to vector<8x128xf32>
    %139 = arith.mulf %138, %137 : vector<8x128xf32>
    %140 = arith.select %17, %139, %137 : vector<8x128xi1>, vector<8x128xf32>
    %141 = arith.negf %140 : vector<8x128xf32>
    %142 = math.exp %141 : vector<8x128xf32>
    %cst_58 = arith.constant 1.000000e+00 : f32
    %143 = vector.broadcast %cst_58 : f32 to vector<8x128xf32>
    %144 = arith.addf %143, %142 : vector<8x128xf32>
    %145 = arith.divf %143, %144 : vector<8x128xf32>
    %cst_59 = arith.constant 2.000000e+00 : f32
    %146 = vector.broadcast %cst_59 : f32 to vector<8x128xf32>
    %147 = arith.mulf %146, %145 : vector<8x128xf32>
    %cst_60 = arith.constant 1.000000e+00 : f32
    %148 = vector.broadcast %cst_60 : f32 to vector<8x128xf32>
    %149 = arith.subf %147, %148 : vector<8x128xf32>
    %150 = arith.select %17, %149, %145 : vector<8x128xi1>, vector<8x128xf32>
    %c32_i32_61 = arith.constant 32 : i32
    %151 = tpu.dynamic_rotate %150 by %c32_i32_61 dim 1 : vector<8x128xf32>, i32 -> vector<8x128xf32>
    %c64_i32_62 = arith.constant 64 : i32
    %152 = tpu.dynamic_rotate %150 by %c64_i32_62 dim 1 : vector<8x128xf32>, i32 -> vector<8x128xf32>
    %c96_i32_63 = arith.constant 96 : i32
    %153 = tpu.dynamic_rotate %150 by %c96_i32_63 dim 1 : vector<8x128xf32>, i32 -> vector<8x128xf32>
    %154 = arith.mulf %151, %128 : vector<8x128xf32>
    %155 = arith.mulf %152, %150 : vector<8x128xf32>
    %156 = arith.addf %154, %155 : vector<8x128xf32>
    %157 = math.tanh %156 : vector<8x128xf32>
    %158 = arith.mulf %153, %157 : vector<8x128xf32>
    %159 = vector.extract_strided_slice %158 {offsets = [0, 64], sizes = [8, 32], strides = [1, 1]} : vector<8x128xf32> to vector<8x32xf32>
    %c5_i32 = arith.constant 5 : i32
    %c8_i32_64 = arith.constant 8 : i32
    %160 = arith.muli %c5_i32, %c8_i32_64 : i32
    %161 = tpu.assume_multiple %160, 8 : i32
    %162 = arith.index_cast %161 : i32 to index
    %c0_65 = arith.constant 0 : index
    %163 = vector.load %arg11[%162, %c0_65] : memref<64x128xf32, #tpu.memory_space<vmem>>, vector<8x128xf32>
    %cst_66 = arith.constant dense<0.000000e+00> : vector<8x128xf32>
    %164 = tpu.matmul %159, %11, %cst_66 {dimension_numbers = #tpu.dot_dimension_numbers<[1], [0], [0], [1], [0, 0, 1, 1], [], []>} : vector<8x32xf32>, vector<32x128xf32>, vector<8x128xf32> -> vector<8x128xf32>
    %165 = arith.addf %163, %164 : vector<8x128xf32>
    %cst_67 = arith.constant 2.000000e+00 : f32
    %166 = vector.broadcast %cst_67 : f32 to vector<8x128xf32>
    %167 = arith.mulf %166, %165 : vector<8x128xf32>
    %168 = arith.select %17, %167, %165 : vector<8x128xi1>, vector<8x128xf32>
    %169 = arith.negf %168 : vector<8x128xf32>
    %170 = math.exp %169 : vector<8x128xf32>
    %cst_68 = arith.constant 1.000000e+00 : f32
    %171 = vector.broadcast %cst_68 : f32 to vector<8x128xf32>
    %172 = arith.addf %171, %170 : vector<8x128xf32>
    %173 = arith.divf %171, %172 : vector<8x128xf32>
    %cst_69 = arith.constant 2.000000e+00 : f32
    %174 = vector.broadcast %cst_69 : f32 to vector<8x128xf32>
    %175 = arith.mulf %174, %173 : vector<8x128xf32>
    %cst_70 = arith.constant 1.000000e+00 : f32
    %176 = vector.broadcast %cst_70 : f32 to vector<8x128xf32>
    %177 = arith.subf %175, %176 : vector<8x128xf32>
    %178 = arith.select %17, %177, %173 : vector<8x128xi1>, vector<8x128xf32>
    %c32_i32_71 = arith.constant 32 : i32
    %179 = tpu.dynamic_rotate %178 by %c32_i32_71 dim 1 : vector<8x128xf32>, i32 -> vector<8x128xf32>
    %c64_i32_72 = arith.constant 64 : i32
    %180 = tpu.dynamic_rotate %178 by %c64_i32_72 dim 1 : vector<8x128xf32>, i32 -> vector<8x128xf32>
    %c96_i32_73 = arith.constant 96 : i32
    %181 = tpu.dynamic_rotate %178 by %c96_i32_73 dim 1 : vector<8x128xf32>, i32 -> vector<8x128xf32>
    %182 = arith.mulf %179, %156 : vector<8x128xf32>
    %183 = arith.mulf %180, %178 : vector<8x128xf32>
    %184 = arith.addf %182, %183 : vector<8x128xf32>
    %185 = math.tanh %184 : vector<8x128xf32>
    %186 = arith.mulf %181, %185 : vector<8x128xf32>
    %187 = vector.extract_strided_slice %186 {offsets = [0, 64], sizes = [8, 32], strides = [1, 1]} : vector<8x128xf32> to vector<8x32xf32>
    %c6_i32 = arith.constant 6 : i32
    %c8_i32_74 = arith.constant 8 : i32
    %188 = arith.muli %c6_i32, %c8_i32_74 : i32
    %189 = tpu.assume_multiple %188, 8 : i32
    %190 = arith.index_cast %189 : i32 to index
    %c0_75 = arith.constant 0 : index
    %191 = vector.load %arg11[%190, %c0_75] : memref<64x128xf32, #tpu.memory_space<vmem>>, vector<8x128xf32>
    %cst_76 = arith.constant dense<0.000000e+00> : vector<8x128xf32>
    %192 = tpu.matmul %187, %11, %cst_76 {dimension_numbers = #tpu.dot_dimension_numbers<[1], [0], [0], [1], [0, 0, 1, 1], [], []>} : vector<8x32xf32>, vector<32x128xf32>, vector<8x128xf32> -> vector<8x128xf32>
    %193 = arith.addf %191, %192 : vector<8x128xf32>
    %cst_77 = arith.constant 2.000000e+00 : f32
    %194 = vector.broadcast %cst_77 : f32 to vector<8x128xf32>
    %195 = arith.mulf %194, %193 : vector<8x128xf32>
    %196 = arith.select %17, %195, %193 : vector<8x128xi1>, vector<8x128xf32>
    %197 = arith.negf %196 : vector<8x128xf32>
    %198 = math.exp %197 : vector<8x128xf32>
    %cst_78 = arith.constant 1.000000e+00 : f32
    %199 = vector.broadcast %cst_78 : f32 to vector<8x128xf32>
    %200 = arith.addf %199, %198 : vector<8x128xf32>
    %201 = arith.divf %199, %200 : vector<8x128xf32>
    %cst_79 = arith.constant 2.000000e+00 : f32
    %202 = vector.broadcast %cst_79 : f32 to vector<8x128xf32>
    %203 = arith.mulf %202, %201 : vector<8x128xf32>
    %cst_80 = arith.constant 1.000000e+00 : f32
    %204 = vector.broadcast %cst_80 : f32 to vector<8x128xf32>
    %205 = arith.subf %203, %204 : vector<8x128xf32>
    %206 = arith.select %17, %205, %201 : vector<8x128xi1>, vector<8x128xf32>
    %c32_i32_81 = arith.constant 32 : i32
    %207 = tpu.dynamic_rotate %206 by %c32_i32_81 dim 1 : vector<8x128xf32>, i32 -> vector<8x128xf32>
    %c64_i32_82 = arith.constant 64 : i32
    %208 = tpu.dynamic_rotate %206 by %c64_i32_82 dim 1 : vector<8x128xf32>, i32 -> vector<8x128xf32>
    %c96_i32_83 = arith.constant 96 : i32
    %209 = tpu.dynamic_rotate %206 by %c96_i32_83 dim 1 : vector<8x128xf32>, i32 -> vector<8x128xf32>
    %210 = arith.mulf %207, %184 : vector<8x128xf32>
    %211 = arith.mulf %208, %206 : vector<8x128xf32>
    %212 = arith.addf %210, %211 : vector<8x128xf32>
    %213 = math.tanh %212 : vector<8x128xf32>
    %214 = arith.mulf %209, %213 : vector<8x128xf32>
    %215 = vector.extract_strided_slice %214 {offsets = [0, 64], sizes = [8, 32], strides = [1, 1]} : vector<8x128xf32> to vector<8x32xf32>
    %c7_i32 = arith.constant 7 : i32
    %c8_i32_84 = arith.constant 8 : i32
    %216 = arith.muli %c7_i32, %c8_i32_84 : i32
    %217 = tpu.assume_multiple %216, 8 : i32
    %218 = arith.index_cast %217 : i32 to index
    %c0_85 = arith.constant 0 : index
    %219 = vector.load %arg11[%218, %c0_85] : memref<64x128xf32, #tpu.memory_space<vmem>>, vector<8x128xf32>
    %cst_86 = arith.constant dense<0.000000e+00> : vector<8x128xf32>
    %220 = tpu.matmul %215, %11, %cst_86 {dimension_numbers = #tpu.dot_dimension_numbers<[1], [0], [0], [1], [0, 0, 1, 1], [], []>} : vector<8x32xf32>, vector<32x128xf32>, vector<8x128xf32> -> vector<8x128xf32>
    %221 = arith.addf %219, %220 : vector<8x128xf32>
    %cst_87 = arith.constant 2.000000e+00 : f32
    %222 = vector.broadcast %cst_87 : f32 to vector<8x128xf32>
    %223 = arith.mulf %222, %221 : vector<8x128xf32>
    %224 = arith.select %17, %223, %221 : vector<8x128xi1>, vector<8x128xf32>
    %225 = arith.negf %224 : vector<8x128xf32>
    %226 = math.exp %225 : vector<8x128xf32>
    %cst_88 = arith.constant 1.000000e+00 : f32
    %227 = vector.broadcast %cst_88 : f32 to vector<8x128xf32>
    %228 = arith.addf %227, %226 : vector<8x128xf32>
    %229 = arith.divf %227, %228 : vector<8x128xf32>
    %cst_89 = arith.constant 2.000000e+00 : f32
    %230 = vector.broadcast %cst_89 : f32 to vector<8x128xf32>
    %231 = arith.mulf %230, %229 : vector<8x128xf32>
    %cst_90 = arith.constant 1.000000e+00 : f32
    %232 = vector.broadcast %cst_90 : f32 to vector<8x128xf32>
    %233 = arith.subf %231, %232 : vector<8x128xf32>
    %234 = arith.select %17, %233, %229 : vector<8x128xi1>, vector<8x128xf32>
    %c32_i32_91 = arith.constant 32 : i32
    %235 = tpu.dynamic_rotate %234 by %c32_i32_91 dim 1 : vector<8x128xf32>, i32 -> vector<8x128xf32>
    %c64_i32_92 = arith.constant 64 : i32
    %236 = tpu.dynamic_rotate %234 by %c64_i32_92 dim 1 : vector<8x128xf32>, i32 -> vector<8x128xf32>
    %c96_i32_93 = arith.constant 96 : i32
    %237 = tpu.dynamic_rotate %234 by %c96_i32_93 dim 1 : vector<8x128xf32>, i32 -> vector<8x128xf32>
    %238 = arith.mulf %235, %212 : vector<8x128xf32>
    %239 = arith.mulf %236, %234 : vector<8x128xf32>
    %240 = arith.addf %238, %239 : vector<8x128xf32>
    %241 = math.tanh %240 : vector<8x128xf32>
    %242 = arith.mulf %237, %241 : vector<8x128xf32>
    %243 = vector.extract_strided_slice %242 {offsets = [0, 64], sizes = [8, 32], strides = [1, 1]} : vector<8x128xf32> to vector<8x32xf32>
    %c8_i32_94 = arith.constant 8 : i32
    %c0_95 = arith.constant 0 : index
    %c0_96 = arith.constant 0 : index
    %244 = vector.load %arg12[%c0_95, %c0_96] : memref<8x32xf32, #tpu.memory_space<vmem>>, vector<8x32xf32>
    tpu.vector_store %arg12[%c0_95, %c0_96], %243 {strides = array<i32>} : memref<8x32xf32, #tpu.memory_space<vmem>>, vector<8x32xf32>,
    %c0_97 = arith.constant 0 : index
    %c0_98 = arith.constant 0 : index
    %245 = vector.load %arg13[%c0_97, %c0_98] : memref<8x128xf32, #tpu.memory_space<vmem>>, vector<8x128xf32>
    tpu.vector_store %arg13[%c0_97, %c0_98], %240 {strides = array<i32>} : memref<8x128xf32, #tpu.memory_space<vmem>>, vector<8x128xf32>,
    %c0_i32_99 = arith.constant 0 : i32
    %246 = arith.cmpi eq, %arg1, %c0_i32_99 : i32
    %247 = arith.extui %246 : i1 to i32
    %c0_i32_100 = arith.constant 0 : i32
    %248 = arith.cmpi ne, %247, %c0_i32_100 : i32
    scf.if %248 {
      %c0_101 = arith.constant 0 : index
      %c0_102 = arith.constant 0 : index
      %249 = vector.load %arg8[%c0_101, %c0_102] : memref<32x8xf32, #tpu.memory_space<vmem>>, vector<32x8xf32>
      %cst_103 = arith.constant dense<0.000000e+00> : vector<8x8xf32>
      %250 = tpu.matmul %243, %249, %cst_103 {dimension_numbers = #tpu.dot_dimension_numbers<[1], [0], [0], [1], [0, 0, 1, 1], [], []>} : vector<8x32xf32>, vector<32x8xf32>, vector<8x8xf32> -> vector<8x8xf32>
      %c0_104 = arith.constant 0 : index
      %c0_105 = arith.constant 0 : index
      %251 = vector.load %arg9[%c0_104, %c0_105] : memref<1x8xf32, #tpu.memory_space<vmem>>, vector<1x8xf32>
      %252 = vector.broadcast %251 : vector<1x8xf32> to vector<8x8xf32>
      %253 = arith.addf %250, %252 : vector<8x8xf32>
      %cst_106 = arith.constant dense<0xFF800000> : vector<8xf32>
      %254 = vector.multi_reduction <maximumf>, %253, %cst_106 [1] : vector<8x8xf32> to vector<8xf32>
      %255 = vector.shape_cast %254 : vector<8xf32> to vector<8x1xf32>
      %256 = vector.broadcast %255 : vector<8x1xf32> to vector<8x8xf32>
      %257 = arith.subf %253, %256 : vector<8x8xf32>
      %258 = math.exp %257 : vector<8x8xf32>
      %cst_107 = arith.constant dense<0.000000e+00> : vector<8xf32>
      %259 = vector.multi_reduction <add>, %258, %cst_107 [1] : vector<8x8xf32> to vector<8xf32>
      %260 = vector.shape_cast %259 : vector<8xf32> to vector<8x1xf32>
      %261 = math.log %260 : vector<8x1xf32>
      %262 = arith.addf %261, %255 : vector<8x1xf32>
      %cst_108 = arith.constant 0.000000e+00 : f32
      %263 = vector.broadcast %cst_108 : f32 to vector<8x128xf32>
      %c0_109 = arith.constant 0 : index
      %c0_110 = arith.constant 0 : index
      %264 = vector.load %arg10[%c0_109, %c0_110] : memref<8x128xf32, #tpu.memory_space<vmem>>, vector<8x128xf32>
      tpu.vector_store %arg10[%c0_109, %c0_110], %263 {strides = array<i32>} : memref<8x128xf32, #tpu.memory_space<vmem>>, vector<8x128xf32>,
      %265 = vector.broadcast %262 : vector<8x1xf32> to vector<8x8xf32>
      %266 = arith.subf %253, %265 : vector<8x8xf32>
      %c0_111 = arith.constant 0 : index
      %c0_112 = arith.constant 0 : index
      %267 = vector.load %arg10[%c0_111, %c0_112] : memref<8x128xf32, #tpu.memory_space<vmem>>, vector<8x8xf32>
      tpu.vector_store %arg10[%c0_111, %c0_112], %266 {strides = array<i32>} : memref<8x128xf32, #tpu.memory_space<vmem>>, vector<8x8xf32>,
      %c0_113 = arith.constant 0 : index
      %c8 = arith.constant 8 : index
      %268 = vector.load %arg10[%c0_113, %c8] : memref<8x128xf32, #tpu.memory_space<vmem>>, vector<8x32xf32>
      tpu.vector_store %arg10[%c0_113, %c8], %243 {strides = array<i32>} : memref<8x128xf32, #tpu.memory_space<vmem>>, vector<8x32xf32>,
      %269 = vector.extract_strided_slice %240 {offsets = [0, 64], sizes = [8, 32], strides = [1, 1]} : vector<8x128xf32> to vector<8x32xf32>
      %c0_114 = arith.constant 0 : index
      %c40 = arith.constant 40 : index
      %270 = vector.load %arg10[%c0_114, %c40] : memref<8x128xf32, #tpu.memory_space<vmem>>, vector<8x32xf32>
      tpu.vector_store %arg10[%c0_114, %c40], %269 {strides = array<i32>} : memref<8x128xf32, #tpu.memory_space<vmem>>, vector<8x32xf32>,
    } else {
    }
    return
  }
  func.func @transform_0(%arg0: i32, %arg1: i32) -> (i32, i32, i32) {
    %c0_i32 = arith.constant 0 : i32
    %c0_i32_0 = arith.constant 0 : i32
    return %arg0, %arg1, %c0_i32 : i32, i32, i32
  }
  func.func @transform_1(%arg0: i32, %arg1: i32) -> (i32, i32) {
    %c0_i32 = arith.constant 0 : i32
    %c0_i32_0 = arith.constant 0 : i32
    return %arg0, %c0_i32 : i32, i32
  }
  func.func @transform_2(%arg0: i32, %arg1: i32) -> (i32, i32) {
    %c0_i32 = arith.constant 0 : i32
    %c0_i32_0 = arith.constant 0 : i32
    return %arg0, %c0_i32 : i32, i32
  }
  func.func @transform_3(%arg0: i32, %arg1: i32) -> (i32, i32) {
    %c0_i32 = arith.constant 0 : i32
    %c0_i32_0 = arith.constant 0 : i32
    %c0_i32_1 = arith.constant 0 : i32
    return %c0_i32, %c0_i32_0 : i32, i32
  }
  func.func @transform_4(%arg0: i32, %arg1: i32) -> (i32, i32) {
    %c0_i32 = arith.constant 0 : i32
    %c0_i32_0 = arith.constant 0 : i32
    %c0_i32_1 = arith.constant 0 : i32
    return %c0_i32, %c0_i32_0 : i32, i32
  }
  func.func @transform_5(%arg0: i32, %arg1: i32) -> (i32, i32) {
    %c0_i32 = arith.constant 0 : i32
    %c0_i32_0 = arith.constant 0 : i32
    %c0_i32_1 = arith.constant 0 : i32
    return %c0_i32, %c0_i32_0 : i32, i32
  }
  func.func @transform_6(%arg0: i32, %arg1: i32) -> (i32, i32) {
    %c0_i32 = arith.constant 0 : i32
    %c0_i32_0 = arith.constant 0 : i32
    %c0_i32_1 = arith.constant 0 : i32
    return %c0_i32, %c0_i32_0 : i32, i32
  }
  func.func @transform_7(%arg0: i32, %arg1: i32) -> (i32, i32) {
    %c0_i32 = arith.constant 0 : i32
    %c0_i32_0 = arith.constant 0 : i32
    %c0_i32_1 = arith.constant 0 : i32
    return %c0_i32, %c0_i32_0 : i32, i32
  }
  func.func @transform_8(%arg0: i32, %arg1: i32) -> (i32, i32) {
    %c0_i32 = arith.constant 0 : i32
    %c0_i32_0 = arith.constant 0 : i32
    return %arg0, %c0_i32 : i32, i32
  }
}

</mosaic_0001>

<bundles_post_ra>
// kernel: tpu_custom_call.1
= control target key start
LH: loop header
LB: loop body
LE: loop exit
PB: predicated region body
PF: predicated region fallthrough
CT: control target
= control target key end

     0   :  { %vm62_vm0 = vcmask 130048   ;;  %v1490_v3 = vmov 0.0|0.0   ;;  %v1491_v7 = vmov 0.0   ;;  %vm35_vm1 = vcmask 261120   ;;  %s1793_s0 = inlined_call_operand.vmem [shape: f32[1,64,16], index: 0, kind: input, shape index: {}]   ;;  %s1794_s1 = inlined_call_operand.vmem [shape: f32[8,32], index: 1, kind: input, shape index: {}]   ;;  %s1795_s2 = inlined_call_operand.vmem [shape: f32[8,32], index: 2, kind: input, shape index: {}]   ;;  %s1796_s3 = inlined_call_operand.vmem [shape: f32[16,128], index: 3, kind: input, shape index: {}]   ;;  %s1797_s4 = inlined_call_operand.vmem [shape: f32[32,128], index: 4, kind: input, shape index: {}]   ;;  %s1798_s5 = inlined_call_operand.vmem [shape: f32[1,128], index: 5, kind: input, shape index: {}]   ;;  %s1799_s6 = inlined_call_operand.vmem [shape: f32[32,8], index: 6, kind: input, shape index: {}]   ;;  %s1800_s7 = inlined_call_operand.vmem [shape: f32[1,8], index: 7, kind: input, shape index: {}]   ;;  %s1801_s8 = inlined_call_operand.hbm [shape: f32[8,128], index: 8, kind: output, shape index: {}]  }
   0x1   :  { %v53_v0 = vld [vmem:[%s1796_s3] sm:$0xff]  ;;  %v54_v1 = vld [vmem:[%s1796_s3 + $0x8] sm:$0xff]  ;;  %1351 = vmatprep.subr.bf16.mxu1 %v1490_v3  ;;  %37 = vst [vmem:[#allocation4] sm:$0xff] %v1491_v7  ;;  %1114 = vst [vmem:[#allocation5] sm:$0xff] %v1491_v7  ;;  %vm1492_vm2 = vmmov 0  }
   0x2   :  { %v200_v2 = vld [vmem:[%s1797_s4] sm:$0xff]  ;;  %v1347_v4 = vpack.c.bf16 %v54_v1, %v53_v0  ;;  %v201_v5 = vld [vmem:[%s1797_s4 + $0x8] sm:$0xff]  ;;  %v202_v9 = vld [vmem:[%s1797_s4 + $0x10] sm:$0xff]  ;;  %1256 = vmatprep.mubr.msk.f32.mxu1 %vm1492_vm2, %v1491_v7 }
   0x3   :  { %v45_v6 = vld [vmem:[%s1793_s0] sm:$0xff]  ;;  %v1562_v8 = vpack.c.bf16 %v201_v5, %v200_v2  ;;  %v203_v10 = vld [vmem:[%s1797_s4 + $0x18] sm:$0xff] }
   0x4   :  { %1236 = vmatprep.mubr.msk.f32.mxu0 %vm62_vm0, %v45_v6  ;;  %v34_v11 = vld [vmem:[%s1794_s1] sm:$0xff]  ;;  %1348 = vmatprep.subr.bf16.mxu0 %v1347_v4 }
   0x5   :  { %36 = vst.msk [vmem:[#allocation3] sm:$0xff] %vm35_vm1, %v34_v11 }
   0x6   :  { %13 = vsyncpa [#allocation6], 0  ;;  %1353 = vmatpush3.bf16.msra.mxu1 %v1562_v8  ;;  %1350 = vmatpush3.bf16.msra.mxu0 %v1347_v4  ;;  %v46_v12 = vld [vmem:[%s1793_s0 + $0x8] sm:$0xff]  ;;  %v1581_v13 = vpack.c.bf16 %v203_v10, %v202_v9  ;;  %v38_v15 = vld [vmem:[%s1795_s2] sm:$0xff]  ;;  %s1493_s22 = smov 64   ;;  %v204_v16 = vlaneseq  ;;  %vm43_vm6 = vcmask 785920  }
   0x7   :  { %1354 = vmatprep.subr.bf16.mxu1 %v1490_v3  ;;  %1363 = vmatprep.subr.bf16.mxu0 %v1490_v3  ;;  %v1606_v17 = vld [vmem:[%s1798_s5] ss:$0 sm:$0xff]  ;;  %s1494_s2 = smov 32   ;;  %s1495_s5 = smov 96   ;;  %v47_v59 = vld [vmem:[%s1793_s0 + $0x10] sm:$0xff]  ;;  %v48_v60 = vld [vmem:[%s1793_s0 + $0x18] sm:$0xff] }
   0x8   :  { %40 = vrot.lane.b32.xlu0 %v38_v15, %s1493_s22  ;;  %v205_v18 = vand.u32 127, %v204_v16  ;;  %v49_v61 = vld [vmem:[%s1793_s0 + $0x20] sm:$0xff]  ;;  %v50_v62 = vld [vmem:[%s1793_s0 + $0x28] sm:$0xff]  ;;  %v51_v63 = vld [vmem:[%s1793_s0 + $0x30] sm:$0xff]  ;;  %vm1101_vm7 = vcmask 64512   ;;  %s1496_s1 = smov 104  }
   0x9   :  { %1237 = vmatmul.mubr.msk.f32.vlgmr.msra.gmra.mrb[0].mxu0 %vm62_vm0, %v46_v12  ;;  %v52_v0 = vld [vmem:[%s1793_s0 + $0x38] sm:$0xff]  ;;  %s1497_s4 = smov 72   ;;  %vm1120_vm8 = vcmask 326720   ;;  %vm1126_vm9 = vcmask 589120  }
   0xa   :  { %1356 = vmatpush3.bf16.msra.mxu1 %v1581_v13  ;;  %1365 = vmatpush3.bf16.msra.mxu0 %v1562_v8  ;;  %vm206_vm3 = vcmp.ge.s32.totalorder %v205_v18, 64  ;;  %vm207_vm4 = vcmp.lt.s32.totalorder %v205_v18, 96 }
   0xb   :  { %1357 = vmatprep.subr.bf16.mxu1 %v1490_v3  ;;  %1366 = vmatprep.subr.bf16.mxu0 %v1490_v3  ;;  %vm1609_vm5 = vmand %vm206_vm3, %vm207_vm4 }
   0xc   :  { %v209_v14 = vld [vmem:[#allocation3] sm:$0xff]  ;;  %1239 = vmatprep.mubr.msk.f32.mxu0 %vm62_vm0, %v47_v59 }
   0xd   :  { %1257 = vmatmul.mubr.msk.f32.vlgmr.msra.gmra.mrb[0].mxu1 %vm35_vm1, %v209_v14  ;;  %1240 = vmatmul.mubr.msk.f32.gmra.mrb[2].mxu0 %vm62_vm0, %v48_v60 }
   0xe   :  { %1359 = vmatpush3.bf16.msra.mxu1 %v1562_v8  ;;  %1267 = vmatprep.mubr.msk.f32.mxu1 %vm1492_vm2, %v1491_v7 }
   0xf   :  { %1360 = vmatprep.subr.bf16.mxu1 %v1490_v3  ;;  %1368 = vmatpush3.bf16.msra.mxu0 %v1581_v13 }
  0x10   :  { %1375 = vmatprep.subr.bf16.mxu0 %v1490_v3  ;;  %1242 = vmatprep.mubr.msk.f32.mxu0 %vm62_vm0, %v49_v61 }
  0x11   :  { %1243 = vmatmul.mubr.msk.f32.gmra.mrb[4].mxu0 %vm62_vm0, %v50_v62 }
  0x12   :  { %1362 = vmatpush3.bf16.msra.mxu1 %v1581_v13  ;;  %1245 = vmatprep.mubr.msk.f32.mxu0 %vm62_vm0, %v51_v63 }
  0x13   :  { %1369 = vmatprep.subr.bf16.mxu1 %v1490_v3 }
  0x15   :  { %1246 = vmatmul.mubr.msk.f32.gmra.mrb[6].mxu0 %vm62_vm0, %v52_v0 }
  0x16   :  { %1278 = vmatprep.mubr.msk.f32.mxu0 %vm1492_vm2, %v1491_v7 }
  0x7a   :  { %v41_v29 = vpop.permute.xlu0 %40 }
  0x7b   :  { %44 = vst.msk [vmem:[#allocation4] sm:$0xff] %vm43_vm6, %v41_v29 }
  0x82   :  { %v210_v36 = vld [vmem:[#allocation4] sm:$0xff] }
  0xdc   :  { %v1238_v19 = vpop.f32.mrb[0].mxu0 }
  0xdd   :  { %v153_v20 = vpop.f32.mrb[1].mxu0  ;;  %v159_v46 = vadd.f32 %v1238_v19, %v1606_v17 }
  0xde   :  { %v154_v21 = vadd.f32 %v1606_v17, %v153_v20 }
  0xe0   :  { %v282_v22 = vpop.f32.mrb[0].mxu1  ;;  %v1241_v12 = vpop.f32.mrb[2].mxu0 }
  0xe1   :  { %v286_v23 = vadd.f32 %v282_v22, %v154_v21  ;;  %v1258_v24 = vpop.f32.mrb[1].mxu1  ;;  %v163_v14 = vpop.f32.mrb[3].mxu0 }
  0xe2   :  { %v164_v21 = vadd.f32 %v1606_v17, %v163_v14 }
  0xe3   :  { %v287_v26 = vmul.f32 2.0, %v286_v23 }
  0xe4   :  { %v1663_v15 = vpop.f32.mrb[4].mxu0 }
  0xe5   :  { %v288_v27 = vsel %vm1609_vm5, %v287_v26, %v286_v23  ;;  %v1665_v16 = vpop.f32.mrb[5].mxu0 }
  0xe6   :  { %v1152_v28 = vmul.f32 -1.442695, %v288_v27 }
  0xe8   :  { %1414 = vpow2.f32 %v1152_v28  ;;  %v1667_v18 = vpop.f32.mrb[6].mxu0 }
  0xe9   :  { %v1669_v19 = vpop.f32.mrb[7].mxu0 }
  0xf2   :  { %v1415_v30 = vpop.eup %1414 }
  0xf3   :  { %v292_v31 = vadd.f32 1.0, %v1415_v30 }
  0xf5   :  { %1416 = vrcp.f32 %v292_v31 }
  0xff   :  { %v1417_v32 = vpop.eup %1416 }
 0x100   :  { %v295_v33 = vmul.f32 2.0, %v1417_v32 }
 0x102   :  { %v1153_v34 = vadd.f32 -1.0, %v295_v33 }
 0x104   :  { %v297_v35 = vsel %vm1609_vm5, %v1153_v34, %v1417_v32 }
 0x105   :  { %300 = vrot.lane.b32.xlu1 %v297_v35, %s1493_s22  ;;  %298 = vrot.lane.b32.xlu0 %v297_v35, %s1494_s2 }
 0x109   :  { %302 = vrot.lane.b32.xlu1 %v297_v35, %s1495_s5 }
 0x177   :  { %v301_v37 = vpop.permute.xlu1 %300  ;;  %v299_v38 = vpop.permute.xlu0 %298 }
 0x178   :  { %v305_v39 = vmul.f32 %v301_v37, %v297_v35  ;;  %v304_v40 = vmul.f32 %v299_v38, %v210_v36 }
 0x17a   :  { %v306_v41 = vadd.f32 %v305_v39, %v304_v40 }
 0x17b   :  { %v303_v43 = vpop.permute.xlu1 %302 }
 0x17c   :  { %1418 = vtanh.f32 %v306_v41 }
 0x186   :  { %v1419_v42 = vpop.eup %1418 }
 0x187   :  { %v308_v44 = vmul.f32 %v1419_v42, %v303_v43 }
 0x189   :  { %312 = vrot.lane.b32.xlu0 %v308_v44, %s1493_s22  ;;  %v169_v44 = vadd.f32 %v1241_v12, %v1606_v17 }
 0x1fb   :  { %v313_v45 = vpop.permute.xlu0 %312 }
 0x1fc   :  { %1268 = vmatmul.mubr.msk.f32.vlgmr.msra.gmra.mrb[2].mxu1 %vm35_vm1, %v313_v45 }
 0x1fd   :  { %1371 = vmatpush3.bf16.msra.mxu1 %v1562_v8  ;;  %1289 = vmatprep.mubr.msk.f32.mxu1 %vm1492_vm2, %v1491_v7 }
 0x1fe   :  { %1372 = vmatprep.subr.bf16.mxu1 %v1490_v3 }
 0x201   :  { %1374 = vmatpush3.bf16.msra.mxu1 %v1581_v13 }
 0x202   :  { %1381 = vmatprep.subr.bf16.mxu1 %v1490_v3 }
 0x2cf   :  { %v382_v47 = vpop.f32.mrb[2].mxu1 }
 0x2d0   :  { %v386_v48 = vadd.f32 %v382_v47, %v159_v46  ;;  %v1269_v49 = vpop.f32.mrb[3].mxu1 }
 0x2d2   :  { %v387_v50 = vmul.f32 2.0, %v386_v48 }
 0x2d4   :  { %v388_v51 = vsel %vm1609_vm5, %v387_v50, %v386_v48 }
 0x2d5   :  { %v1155_v52 = vmul.f32 -1.442695, %v388_v51 }
 0x2d7   :  { %1420 = vpow2.f32 %v1155_v52 }
 0x2e1   :  { %v1421_v53 = vpop.eup %1420 }
 0x2e2   :  { %v392_v54 = vadd.f32 1.0, %v1421_v53 }
 0x2e4   :  { %1422 = vrcp.f32 %v392_v54 }
 0x2ee   :  { %v1423_v55 = vpop.eup %1422 }
 0x2ef   :  { %v395_v56 = vmul.f32 2.0, %v1423_v55 }
 0x2f1   :  { %v1156_v57 = vadd.f32 -1.0, %v395_v56 }
 0x2f3   :  { %v397_v58 = vsel %vm1609_vm5, %v1156_v57, %v1423_v55 }
 0x2f4   :  { %400 = vrot.lane.b32.xlu0 %v397_v58, %s1493_s22  ;;  %398 = vrot.lane.b32.xlu1 %v397_v58, %s1494_s2 }
 0x2f8   :  { %402 = vrot.lane.b32.xlu1 %v397_v58, %s1495_s5 }
 0x366   :  { %v401_v1 = vpop.permute.xlu0 %400  ;;  %v399_v2 = vpop.permute.xlu1 %398 }
 0x367   :  { %v405_v4 = vmul.f32 %v401_v1, %v397_v58  ;;  %v404_v5 = vmul.f32 %v399_v2, %v306_v41  ;;  %v174_v2 = vadd.f32 %v1606_v17, %v1665_v16 }
 0x369   :  { %v406_v6 = vadd.f32 %v405_v4, %v404_v5 }
 0x36a   :  { %v403_v10 = vpop.permute.xlu1 %402 }
 0x36b   :  { %1424 = vtanh.f32 %v406_v6 }
 0x375   :  { %v1425_v9 = vpop.eup %1424 }
 0x376   :  { %v408_v11 = vmul.f32 %v1425_v9, %v403_v10 }
 0x378   :  { %412 = vrot.lane.b32.xlu0 %v408_v11, %s1493_s22 }
 0x3ea   :  { %v413_v20 = vpop.permute.xlu0 %412 }
 0x3eb   :  { %1279 = vmatmul.mubr.msk.f32.vlgmr.msra.gmra.mrb[8].mxu0 %vm35_vm1, %v413_v20 }
 0x3ec   :  { %1377 = vmatpush3.bf16.msra.mxu0 %v1562_v8  ;;  %1300 = vmatprep.mubr.msk.f32.mxu0 %vm1492_vm2, %v1491_v7 }
 0x3ed   :  { %1378 = vmatprep.subr.bf16.mxu0 %v1490_v3 }
 0x3f0   :  { %1380 = vmatpush3.bf16.msra.mxu0 %v1581_v13 }
 0x3f1   :  { %1387 = vmatprep.subr.bf16.mxu0 %v1490_v3 }
 0x4be   :  { %v482_v22 = vpop.f32.mrb[8].mxu0 }
 0x4bf   :  { %v486_v23 = vadd.f32 %v482_v22, %v164_v21  ;;  %v1280_v24 = vpop.f32.mrb[9].mxu0 }
 0x4c1   :  { %v487_v26 = vmul.f32 2.0, %v486_v23 }
 0x4c3   :  { %v488_v27 = vsel %vm1609_vm5, %v487_v26, %v486_v23 }
 0x4c4   :  { %v1158_v28 = vmul.f32 -1.442695, %v488_v27 }
 0x4c6   :  { %1426 = vpow2.f32 %v1158_v28 }
 0x4d0   :  { %v1427_v29 = vpop.eup %1426 }
 0x4d1   :  { %v492_v30 = vadd.f32 1.0, %v1427_v29 }
 0x4d3   :  { %1428 = vrcp.f32 %v492_v30 }
 0x4dd   :  { %v1429_v31 = vpop.eup %1428 }
 0x4de   :  { %v495_v32 = vmul.f32 2.0, %v1429_v31 }
 0x4e0   :  { %v1159_v33 = vadd.f32 -1.0, %v495_v32 }
 0x4e2   :  { %v497_v34 = vsel %vm1609_vm5, %v1159_v33, %v1429_v31  ;;  %v179_v33 = vadd.f32 %v1663_v15, %v1606_v17 }
 0x4e3   :  { %500 = vrot.lane.b32.xlu0 %v497_v34, %s1493_s22  ;;  %498 = vrot.lane.b32.xlu1 %v497_v34, %s1494_s2 }
 0x4e7   :  { %502 = vrot.lane.b32.xlu1 %v497_v34, %s1495_s5 }
 0x555   :  { %v501_v35 = vpop.permute.xlu0 %500  ;;  %v499_v36 = vpop.permute.xlu1 %498 }
 0x556   :  { %v505_v37 = vmul.f32 %v501_v35, %v497_v34  ;;  %v504_v38 = vmul.f32 %v499_v36, %v406_v6 }
 0x558   :  { %v506_v39 = vadd.f32 %v505_v37, %v504_v38 }
 0x559   :  { %v503_v41 = vpop.permute.xlu1 %502 }
 0x55a   :  { %1430 = vtanh.f32 %v506_v39 }
 0x564   :  { %v1431_v40 = vpop.eup %1430 }
 0x565   :  { %v508_v42 = vmul.f32 %v1431_v40, %v503_v41 }
 0x567   :  { %512 = vrot.lane.b32.xlu0 %v508_v42, %s1493_s22 }
 0x5d9   :  { %v513_v43 = vpop.permute.xlu0 %512 }
 0x5da   :  { %1290 = vmatmul.mubr.msk.f32.vlgmr.msra.gmra.mrb[4].mxu1 %vm35_vm1, %v513_v43 }
 0x5db   :  { %1383 = vmatpush3.bf16.msra.mxu1 %v1562_v8  ;;  %1311 = vmatprep.mubr.msk.f32.mxu1 %vm1492_vm2, %v1491_v7 }
 0x5dc   :  { %1384 = vmatprep.subr.bf16.mxu1 %v1490_v3 }
 0x5df   :  { %1386 = vmatpush3.bf16.msra.mxu1 %v1581_v13 }
 0x5e0   :  { %1393 = vmatprep.subr.bf16.mxu1 %v1490_v3 }
 0x6ad   :  { %v582_v45 = vpop.f32.mrb[4].mxu1 }
 0x6ae   :  { %v586_v46 = vadd.f32 %v582_v45, %v169_v44  ;;  %v1291_v47 = vpop.f32.mrb[5].mxu1 }
 0x6b0   :  { %v587_v48 = vmul.f32 2.0, %v586_v46 }
 0x6b2   :  { %v588_v49 = vsel %vm1609_vm5, %v587_v48, %v586_v46 }
 0x6b3   :  { %v1161_v50 = vmul.f32 -1.442695, %v588_v49 }
 0x6b5   :  { %1432 = vpow2.f32 %v1161_v50 }
 0x6bf   :  { %v1433_v51 = vpop.eup %1432 }
 0x6c0   :  { %v592_v52 = vadd.f32 1.0, %v1433_v51 }
 0x6c2   :  { %1434 = vrcp.f32 %v592_v52  ;;  %v184_v52 = vadd.f32 %v1606_v17, %v1669_v19 }
 0x6cc   :  { %v1435_v53 = vpop.eup %1434 }
 0x6cd   :  { %v595_v54 = vmul.f32 2.0, %v1435_v53 }
 0x6cf   :  { %v1162_v55 = vadd.f32 -1.0, %v595_v54 }
 0x6d1   :  { %v597_v56 = vsel %vm1609_vm5, %v1162_v55, %v1435_v53 }
 0x6d2   :  { %600 = vrot.lane.b32.xlu0 %v597_v56, %s1493_s22  ;;  %598 = vrot.lane.b32.xlu1 %v597_v56, %s1494_s2 }
 0x6d6   :  { %602 = vrot.lane.b32.xlu1 %v597_v56, %s1495_s5 }
 0x744   :  { %v601_v57 = vpop.permute.xlu0 %600  ;;  %v599_v58 = vpop.permute.xlu1 %598 }
 0x745   :  { %v605_v59 = vmul.f32 %v601_v57, %v597_v56  ;;  %v604_v60 = vmul.f32 %v599_v58, %v506_v39 }
 0x747   :  { %v606_v61 = vadd.f32 %v605_v59, %v604_v60 }
 0x748   :  { %v603_v63 = vpop.permute.xlu1 %602 }
 0x749   :  { %1436 = vtanh.f32 %v606_v61 }
 0x753   :  { %v1437_v62 = vpop.eup %1436 }
 0x754   :  { %v608_v0 = vmul.f32 %v1437_v62, %v603_v63 }
 0x756   :  { %612 = vrot.lane.b32.xlu0 %v608_v0, %s1493_s22 }
 0x7c8   :  { %v613_v1 = vpop.permute.xlu0 %612 }
 0x7c9   :  { %1301 = vmatmul.mubr.msk.f32.vlgmr.msra.gmra.mrb[10].mxu0 %vm35_vm1, %v613_v1 }
 0x7ca   :  { %1389 = vmatpush3.bf16.msra.mxu0 %v1562_v8  ;;  %1322 = vmatprep.mubr.msk.f32.mxu0 %vm1492_vm2, %v1491_v7 }
 0x7cb   :  { %1390 = vmatprep.subr.bf16.mxu0 %v1490_v3 }
 0x7ce   :  { %1392 = vmatpush3.bf16.msra.mxu0 %v1581_v13 }
 0x7cf   :  { %1399 = vmatprep.subr.bf16.mxu0 %v1490_v3 }
 0x89c   :  { %v682_v4 = vpop.f32.mrb[10].mxu0 }
 0x89d   :  { %v686_v5 = vadd.f32 %v682_v4, %v174_v2  ;;  %v1302_v6 = vpop.f32.mrb[11].mxu0 }
 0x89f   :  { %v687_v9 = vmul.f32 2.0, %v686_v5 }
 0x8a1   :  { %v688_v10 = vsel %vm1609_vm5, %v687_v9, %v686_v5 }
 0x8a2   :  { %v1164_v11 = vmul.f32 -1.442695, %v688_v10 }
 0x8a4   :  { %1438 = vpow2.f32 %v1164_v11  ;;  %v189_v11 = vadd.f32 %v1667_v18, %v1606_v17  ;;  %v1018_v17 = vld [vmem:[%s1799_s6] sm:$0xff]  ;;  %v1019_v18 = vld [vmem:[%s1799_s6 + $0x8] sm:$0xff] }
 0x8a5   :  { %v1400_v25 = vpack.c.bf16 %v1019_v18, %v1018_v17 }
 0x8ae   :  { %v1439_v12 = vpop.eup %1438 }
 0x8af   :  { %v692_v14 = vadd.f32 1.0, %v1439_v12 }
 0x8b1   :  { %1440 = vrcp.f32 %v692_v14 }
 0x8bb   :  { %v1441_v20 = vpop.eup %1440 }
 0x8bc   :  { %v695_v21 = vmul.f32 2.0, %v1441_v20 }
 0x8be   :  { %v1165_v22 = vadd.f32 -1.0, %v695_v21 }
 0x8c0   :  { %v697_v23 = vsel %vm1609_vm5, %v1165_v22, %v1441_v20 }
 0x8c1   :  { %700 = vrot.lane.b32.xlu0 %v697_v23, %s1493_s22  ;;  %698 = vrot.lane.b32.xlu1 %v697_v23, %s1494_s2 }
 0x8c5   :  { %702 = vrot.lane.b32.xlu1 %v697_v23, %s1495_s5 }
 0x933   :  { %v701_v16 = vpop.permute.xlu0 %700  ;;  %v699_v24 = vpop.permute.xlu1 %698 }
 0x934   :  { %v705_v26 = vmul.f32 %v701_v16, %v697_v23  ;;  %v704_v27 = vmul.f32 %v699_v24, %v606_v61 }
 0x936   :  { %v706_v28 = vadd.f32 %v705_v26, %v704_v27 }
 0x937   :  { %v703_v30 = vpop.permute.xlu1 %702 }
 0x938   :  { %1442 = vtanh.f32 %v706_v28 }
 0x942   :  { %v1443_v29 = vpop.eup %1442 }
 0x943   :  { %v708_v31 = vmul.f32 %v1443_v29, %v703_v30  ;;  %v1020_v30 = vld [vmem:[%s1799_s6 + $0x10] sm:$0xff] }
 0x945   :  { %712 = vrot.lane.b32.xlu0 %v708_v31, %s1493_s22  ;;  %v1021_v31 = vld [vmem:[%s1799_s6 + $0x18] sm:$0xff] }
 0x9b7   :  { %v713_v32 = vpop.permute.xlu0 %712 }
 0x9b8   :  { %1312 = vmatmul.mubr.msk.f32.vlgmr.msra.gmra.mrb[6].mxu1 %vm35_vm1, %v713_v32  ;;  %v1403_v32 = vpack.c.bf16 %v1021_v31, %v1020_v30 }
 0x9b9   :  { %1395 = vmatpush3.bf16.msra.mxu1 %v1562_v8  ;;  %1333 = vmatprep.mubr.msk.f32.mxu1 %vm1492_vm2, %v1491_v7 }
 0x9ba   :  { %1396 = vmatprep.subr.bf16.mxu1 %v1490_v3 }
 0x9bd   :  { %1398 = vmatpush3.bf16.msra.mxu1 %v1581_v13 }
 0xa8b   :  { %v782_v34 = vpop.f32.mrb[6].mxu1 }
 0xa8c   :  { %v786_v35 = vadd.f32 %v782_v34, %v179_v33  ;;  %v1313_v36 = vpop.f32.mrb[7].mxu1 }
 0xa8e   :  { %v787_v37 = vmul.f32 2.0, %v786_v35 }
 0xa90   :  { %v788_v38 = vsel %vm1609_vm5, %v787_v37, %v786_v35 }
 0xa91   :  { %v1167_v39 = vmul.f32 -1.442695, %v788_v38 }
 0xa93   :  { %1444 = vpow2.f32 %v1167_v39 }
 0xa9d   :  { %v1445_v8 = vpop.eup %1444 }
 0xa9e   :  { %v792_v40 = vadd.f32 1.0, %v1445_v8 }
 0xaa0   :  { %1446 = vrcp.f32 %v792_v40 }
 0xaaa   :  { %v1447_v41 = vpop.eup %1446 }
 0xaab   :  { %v795_v42 = vmul.f32 2.0, %v1447_v41 }
 0xaad   :  { %v1168_v43 = vadd.f32 -1.0, %v795_v42 }
 0xaaf   :  { %v797_v13 = vsel %vm1609_vm5, %v1168_v43, %v1447_v41 }
 0xab0   :  { %800 = vrot.lane.b32.xlu0 %v797_v13, %s1493_s22  ;;  %798 = vrot.lane.b32.xlu1 %v797_v13, %s1494_s2 }
 0xab4   :  { %802 = vrot.lane.b32.xlu1 %v797_v13, %s1495_s5 }
 0xb22   :  { %v801_v15 = vpop.permute.xlu0 %800  ;;  %v799_v44 = vpop.permute.xlu1 %798 }
 0xb23   :  { %v805_v45 = vmul.f32 %v801_v15, %v797_v13  ;;  %v804_v46 = vmul.f32 %v799_v44, %v706_v28 }
 0xb25   :  { %v806_v47 = vadd.f32 %v805_v45, %v804_v46 }
 0xb26   :  { %v803_v49 = vpop.permute.xlu1 %802 }
 0xb27   :  { %1448 = vtanh.f32 %v806_v47 }
 0xb31   :  { %v1449_v48 = vpop.eup %1448 }
 0xb32   :  { %v808_v50 = vmul.f32 %v1449_v48, %v803_v49 }
 0xb34   :  { %812 = vrot.lane.b32.xlu0 %v808_v50, %s1493_s22 }
 0xba6   :  { %v813_v51 = vpop.permute.xlu0 %812 }
 0xba7   :  { %1323 = vmatmul.mubr.msk.f32.vlgmr.msra.gmra.mrb[12].mxu0 %vm35_vm1, %v813_v51 }
 0xba8   :  { %1344 = vmatprep.mubr.msk.f32.mxu0 %vm1492_vm2, %v1491_v7  ;;  %1401 = vmatpush3.bf16.msra.mxu0 %v1400_v25 }
 0xba9   :  { %1402 = vmatprep.subr.bf16.mxu0 %v1490_v3  ;;  %v1175_v3 = vld [vmem:[%s1800_s7] ss:$0 sm:$0xff]  ;;  %s1498_s7 = smov [#allocation5]  }
 0xbac   :  { %1404 = vmatpush3.bf16.msra.mxu0 %v1403_v32 }
 0xc7a   :  { %v882_v53 = vpop.f32.mrb[12].mxu0 }
 0xc7b   :  { %v886_v54 = vadd.f32 %v882_v53, %v184_v52  ;;  %v1324_v55 = vpop.f32.mrb[13].mxu0 }
 0xc7d   :  { %v887_v56 = vmul.f32 2.0, %v886_v54 }
 0xc7f   :  { %v888_v57 = vsel %vm1609_vm5, %v887_v56, %v886_v54 }
 0xc80   :  { %v1170_v58 = vmul.f32 -1.442695, %v888_v57 }
 0xc82   :  { %1450 = vpow2.f32 %v1170_v58 }
 0xc8c   :  { %v1451_v59 = vpop.eup %1450 }
 0xc8d   :  { %v892_v60 = vadd.f32 1.0, %v1451_v59 }
 0xc8f   :  { %1452 = vrcp.f32 %v892_v60 }
 0xc99   :  { %v1453_v61 = vpop.eup %1452 }
 0xc9a   :  { %v895_v62 = vmul.f32 2.0, %v1453_v61 }
 0xc9c   :  { %v1171_v63 = vadd.f32 -1.0, %v895_v62 }
 0xc9e   :  { %v897_v7 = vsel %vm1609_vm5, %v1171_v63, %v1453_v61 }
 0xc9f   :  { %900 = vrot.lane.b32.xlu0 %v897_v7, %s1493_s22  ;;  %898 = vrot.lane.b32.xlu1 %v897_v7, %s1494_s2 }
 0xca3   :  { %902 = vrot.lane.b32.xlu1 %v897_v7, %s1495_s5 }
 0xd11   :  { %v901_v19 = vpop.permute.xlu0 %900  ;;  %v899_v0 = vpop.permute.xlu1 %898 }
 0xd12   :  { %v905_v1 = vmul.f32 %v901_v19, %v897_v7  ;;  %v904_v2 = vmul.f32 %v899_v0, %v806_v47 }
 0xd14   :  { %v906_v4 = vadd.f32 %v905_v1, %v904_v2 }
 0xd15   :  { %v903_v6 = vpop.permute.xlu1 %902 }
 0xd16   :  { %1454 = vtanh.f32 %v906_v4 }
 0xd20   :  { %v1455_v5 = vpop.eup %1454 }
 0xd21   :  { %v908_v9 = vmul.f32 %v1455_v5, %v903_v6 }
 0xd23   :  { %912 = vrot.lane.b32.xlu0 %v908_v9, %s1493_s22 }
 0xd95   :  { %v913_v10 = vpop.permute.xlu0 %912 }
 0xd96   :  { %1334 = vmatmul.mubr.msk.f32.vlgmr.msra.gmra.mrb[8].mxu1 %vm35_vm1, %v913_v10 }
 0xe69   :  { %v982_v12 = vpop.f32.mrb[8].mxu1 }
 0xe6a   :  { %v986_v14 = vadd.f32 %v982_v12, %v189_v11  ;;  %v1335_v20 = vpop.f32.mrb[9].mxu1 }
 0xe6c   :  { %v987_v21 = vmul.f32 2.0, %v986_v14 }
 0xe6e   :  { %v988_v22 = vsel %vm1609_vm5, %v987_v21, %v986_v14 }
 0xe6f   :  { %v1173_v23 = vmul.f32 -1.442695, %v988_v22 }
 0xe71   :  { %1456 = vpow2.f32 %v1173_v23 }
 0xe7b   :  { %v1457_v16 = vpop.eup %1456 }
 0xe7c   :  { %v992_v24 = vadd.f32 1.0, %v1457_v16 }
 0xe7e   :  { %1458 = vrcp.f32 %v992_v24 }
 0xe88   :  { %v1459_v26 = vpop.eup %1458 }
 0xe89   :  { %v995_v27 = vmul.f32 2.0, %v1459_v26 }
 0xe8b   :  { %v1174_v28 = vadd.f32 -1.0, %v995_v27 }
 0xe8d   :  { %v997_v29 = vsel %vm1609_vm5, %v1174_v28, %v1459_v26 }
 0xe8e   :  { %1000 = vrot.lane.b32.xlu0 %v997_v29, %s1493_s22  ;;  %998 = vrot.lane.b32.xlu1 %v997_v29, %s1494_s2 }
 0xe92   :  { %1002 = vrot.lane.b32.xlu1 %v997_v29, %s1495_s5 }
 0xf00   :  { %v1001_v33 = vpop.permute.xlu0 %1000  ;;  %v999_v34 = vpop.permute.xlu1 %998 }
 0xf01   :  { %v1005_v35 = vmul.f32 %v1001_v33, %v997_v29  ;;  %v1004_v36 = vmul.f32 %v999_v34, %v906_v4 }
 0xf03   :  { %v1006_v37 = vadd.f32 %v1005_v35, %v1004_v36 }
 0xf04   :  { %v1003_v39 = vpop.permute.xlu1 %1002 }
 0xf05   :  { %1460 = vtanh.f32 %v1006_v37  ;;  %1014 = vst [vmem:[#allocation4] sm:$0xff] %v1006_v37 }
 0xf0f   :  { %v1461_v38 = vpop.eup %1460 }
 0xf10   :  { %v1008_v8 = vmul.f32 %v1461_v38, %v1003_v39 }
 0xf12   :  { %1010 = vrot.lane.b32.xlu0 %v1008_v8, %s1493_s22  ;;  %s1134_s22 = sshll.u32 %s1498_s7, 4  ;;  %s1135_s22 = int_to_ptr.vmem [resolvable:$true] %s1134_s22 }
 0xf13   :  { %s1466_s23 = scalar_lea.vmem %s1135_s22, 128  ;;  %p1471_p1 = scmp.lt.s32.totalorder %s1135_s22, %s1135_s22 }
 0xf14   :  { %p1467_p0 = scmp.ne.s32.totalorder %s1135_s22, %s1466_s23  ;;  %p1472_p2 = scmp.lt.s32.totalorder %s1466_s23, %s1466_s23 }
 0xf16   :  { %p1473_p3 = por %p1472_p2, %p1471_p1 }
 0xf18   :  { %p1474_p4 = pnand %p1473_p3, %p1467_p0 }
 0xf84   :  { %v1011_v40 = vpop.permute.xlu0 %1010 }
 0xf85   :  { %1013 = vst.msk [vmem:[#allocation3] sm:$0xff] %vm35_vm1, %v1011_v40  ;;  %1345 = vmatmul.mubr.msk.f32.vlgmr.msra.gmra.mrb[14].mxu0 %vm35_vm1, %v1011_v40 }
0x1058   :  { %v1097_v41 = vpop.f32.mrb[14].mxu0 }
0x1059   :  { %v1098_v42 = vadd.f32 %v1175_v3, %v1097_v41  ;;  %v1346_v43 = vpop.f32.mrb[15].mxu0 }
0x105b   :  { %v1102_v13 = vsel %vm1101_vm7, %v1098_v42, -inf }
0x105c   :  { %1103 = vmax.xlane.f32.xlu1 %v1102_v13 }
0x106d   :  { %1123 = vrot.lane.b32.xlu1 %v1006_v37, %s1496_s1 }
0x10e9   :  { %v1104_v15 = vpop.xlane.xlu1 %1103 }
0x10ea   :  { %v1105_v44 = vsub.f32 %v1098_v42, %v1104_v15 }
0x10ec   :  { %v1106_v45 = vmul.f32 1.442695, %v1105_v44 }
0x10ed   :  { %v1124_v54 = vpop.permute.xlu1 %1123 }
0x10ee   :  { %1462 = vpow2.f32 %v1106_v45 }
0x10f8   :  { %v1463_v46 = vpop.eup %1462 }
0x10f9   :  { %v1108_v47 = vsel %vm1101_vm7, %v1463_v46, 0.0 }
0x10fa   :  { %1109 = vadd.xlane.f32.xlu0 %v1108_v47 }
0x1110   :  { %1117 = vrot.lane.b32.xlu0 %v1008_v8, %s1497_s4 }
0x1187   :  { %v1110_v48 = vpop.xlane.xlu0 %1109 }
0x1188   :  { %1464 = vlog2.f32 %v1110_v48 }
0x118b   :  { %v1118_v53 = vpop.permute.xlu0 %1117 }
0x1192   :  { %v1465_v49 = vpop.eup %1464 }
0x1193   :  { %v1112_v50 = vmul.f32 0.6931472, %v1465_v49 }
0x1195   :  { %v1113_v51 = vadd.f32 %v1112_v50, %v1104_v15 }
0x1197   :  { %v1115_v52 = vsub.f32 %v1098_v42, %v1113_v51 }
0x1199   :  { %1116 = vst.msk [vmem:[#allocation5] sm:$0xff] %vm1101_vm7, %v1115_v52 }
0x119a   :  { %1121 = vst.msk [vmem:[#allocation5] sm:$0xff] %vm1120_vm8, %v1118_v53 }
0x119b   :  { %1127 = vst.msk [vmem:[#allocation5] sm:$0xff] %vm1126_vm9, %v1124_v54 }
0x119c   :  { %1477 = shalt.err (!%p1474_p4)
}
0x119d   :  { %s1478_s5 = scalar_lea.hbm %s1801_s8, 128 }
0x119e   :  { %p1479_p5 = scmp.ne.s32.totalorder %s1801_s8, %s1478_s5  ;;  %p1482_p6 = scmp.lt.u32.totalorder %s1478_s5, %s1801_s8 }
0x11a0   :  { %p1484_p7 = pnand %p1482_p6, %p1479_p5 }
0x11a2   :  { %1487 = shalt.err (!%p1484_p7)
}
0x11a3   :  { %1137 = dma.vmem_to_hbm [thread:$0]  %s1135_s22, 128, %s1801_s8, [#allocation6]  }
0x11a4   :  { %1488 = dma.done.wait [#allocation6], 128  }
0x11a5   :  { %1489 = vsyncadd [#allocation6], 4294967168 }
0x11a6   :  { %1141 = vsyncpa [#allocation6], 1 }

</bundles_post_ra>
